<compile_context>
chip_gen: v5e
topology: v5e:2x2
jax: 0.10.0
libtpu: 0.0.40
codegen_flags: <defaults>
</compile_context>

<pallas_src>
import functools

import jax
import jax.numpy as jnp
from jax.experimental import pallas as pl
from jax.experimental.pallas import tpu as pltpu

_LANES = 128
_ACC_ROWS = 8          # one f32 sublane tile; rows 0..2 hold {s_pos, s_neg, n_cnt}


def _balanced_ce_kernel(pred_ref, tgt_ref, out_ref, *, total, tiles_per_chunk,
                        iou_weighted):
    c = pl.program_id(0)          # chunk (parallel -> one per TensorCore on v7x)
    i = pl.program_id(1)          # tile within chunk (sequential reduction carry)

    @pl.when(i == 0)
    def _init():
        out_ref[...] = jnp.zeros_like(out_ref)

    p = pred_ref[...].astype(jnp.float32)      # [tile_r, 128]; cast in-register
    t = tgt_ref[...].astype(jnp.float32)
    R, L = p.shape

    # Elementwise binary cross entropy with PyTorch's log clamp at -100.
    log_p = jnp.maximum(jnp.log(p), -100.0)
    log_1mp = jnp.maximum(jnp.log(1.0 - p), -100.0)
    bce = -(t * log_p + (1.0 - t) * log_1mp)
    pos = t > 0.0
    pos_term = t * bce if iou_weighted else bce

    tile_elems = R * L
    tile_start = (c * tiles_per_chunk + i) * tile_elems
    is_full = tile_start + tile_elems <= total

    def _accumulate(pos_m, neg_m):
        # Sublane-only reductions per step; lane reduction deferred to wrapper.
        s_pos = jnp.sum(jnp.where(pos_m, pos_term, 0.0), axis=0, keepdims=True)
        s_neg = jnp.sum(jnp.where(neg_m, bce, 0.0), axis=0, keepdims=True)
        n_cnt = jnp.sum(jnp.where(pos_m, 1.0, 0.0), axis=0, keepdims=True)
        out_ref[0:1, :] += s_pos
        out_ref[1:2, :] += s_neg
        out_ref[2:3, :] += n_cnt

    @pl.when(is_full)
    def _fast():                  # full tile: no per-element validity mask
        _accumulate(pos, jnp.logical_not(pos))

    @pl.when(jnp.logical_not(is_full))
    def _masked():                # tail / overflow tile: ignore pad & garbage
        r = jax.lax.broadcasted_iota(jnp.int32, (R, L), 0)
        l = jax.lax.broadcasted_iota(jnp.int32, (R, L), 1)
        valid = (tile_start + r * L + l) < total
        _accumulate(jnp.logical_and(valid, pos),
                    jnp.logical_and(valid, jnp.logical_not(pos)))


def balanced_ce_loss_pallas(pred, target, *, alpha=0.75, iou_weighted=True,
                            reduction='sum', tile_rows=1024, num_chunks=2):
    """Matches BalancedCELoss(...).forward(pred, target) with module defaults
    (reduction='sum', weight=None, avg_factor=None).  Returns a scalar f32."""
    assert reduction == 'sum'
    # TODO(synk): optional `weight` / `avg_factor` / reduction_override ('none'/'mean')
    # arguments of the original forward are not implemented (module defaults used).
    total = int(pred.size)

    # Stream at native dtype (bf16 stays bf16 in HBM); cast happens per tile.
    p = pred.reshape(-1)
    t = target.reshape(-1)

    rows = pl.cdiv(total, _LANES)
    if rows * _LANES != total:
        # Only pad when the lane-dense reshape needs it; round rows to a
        # sublane-pack multiple while we are copying anyway.  Pad values are
        # excluded by the in-kernel validity mask on the tail tile.
        rows = pl.cdiv(rows, 16) * 16
        pad = rows * _LANES - total
        p = jnp.pad(p, (0, pad))
        t = jnp.pad(t, (0, pad))
    p = p.reshape(rows, _LANES)
    t = t.reshape(rows, _LANES)

    tile_r = min(int(tile_rows), rows)
    if tile_r < rows:
        tile_r = max(16, (tile_r // 16) * 16)     # keep blocks sublane-aligned
    num_tiles = pl.cdiv(rows, tile_r)
    num_chunks = max(1, min(int(num_chunks), num_tiles))
    tiles_per_chunk = pl.cdiv(num_tiles, num_chunks)

    if num_tiles % num_chunks == 0:
        def row_map(c, i):
            return (c * tiles_per_chunk + i, 0)
    else:
        # Overflow steps re-read the last real tile; their flat indices are all
        # >= total, so the masked path zeroes their contribution.
        def row_map(c, i):
            return (jnp.minimum(c * tiles_per_chunk + i, num_tiles - 1), 0)

    kernel = functools.partial(_balanced_ce_kernel,
                               total=total,
                               tiles_per_chunk=tiles_per_chunk,
                               iou_weighted=bool(iou_weighted))

    parts = pl.pallas_call(
        kernel,
        out_shape=jax.ShapeDtypeStruct((num_chunks * _ACC_ROWS, _LANES), jnp.float32),
        grid=(num_chunks, tiles_per_chunk),
        in_specs=[
            pl.BlockSpec((tile_r, _LANES), row_map),
            pl.BlockSpec((tile_r, _LANES), row_map),
        ],
        out_specs=pl.BlockSpec((_ACC_ROWS, _LANES), lambda c, i: (c, 0)),
        compiler_params=pltpu.CompilerParams(
            dimension_semantics=("parallel", "arbitrary")),
    )(p, t)

    # Tiny final combine (num_chunks x 3 x 128 values) in plain JAX.
    parts = parts.reshape(num_chunks, _ACC_ROWS, _LANES)
    s_pos = jnp.sum(parts[:, 0, :])
    s_neg = jnp.sum(parts[:, 1, :])
    n = jnp.sum(parts[:, 2, :])
    m = float(total) - n
    return s_pos / n + alpha * (s_neg / m)


def balanced_ce_loss_ref(pred, target, alpha=0.75, iou_weighted=True):
    """Pure-JAX reference mirroring the PyTorch BalancedCELoss.forward."""
    pred = pred.astype(jnp.float32)
    target = target.astype(jnp.float32)
    pos = (target > 0.0).astype(jnp.float32)
    neg = (target <= 0.0).astype(jnp.float32)
    N = jnp.sum(pos)
    M = jnp.sum(neg)
    if iou_weighted:
        focal_weight = target * pos / N + alpha * neg / M
    else:
        focal_weight = pos / N + alpha * neg / M
    log_p = jnp.maximum(jnp.log(pred), -100.0)
    log_1mp = jnp.maximum(jnp.log(1.0 - pred), -100.0)
    bce = -(target * log_p + (1.0 - target) * log_1mp)
    loss = bce * focal_weight
    return jnp.sum(loss)   # reduction='sum', weight=None, avg_factor=None


if __name__ == "__main__":
    def make_inputs(key, shape, dtype=jnp.float32):
        k1, k2, k3 = jax.random.split(key, 3)
        # pred: probabilities in (0,1); target: IoU-weighted targets
        # (positives in (0.1, 1], negatives exactly 0), as BalancedCELoss expects.
        pred = jax.nn.sigmoid(jax.random.normal(k1, shape, dtype=jnp.float32))
        pos_mask = (jax.random.uniform(k2, shape) < 0.25).astype(jnp.float32)
        iou_tgt = jax.random.uniform(k3, shape, minval=0.1, maxval=1.0)
        target = pos_mask * iou_tgt
        return pred.astype(dtype), target.astype(dtype)

    # Primary small case (fast path, no padding).
    pred, target = make_inputs(jax.random.PRNGKey(0), (2, 4, 16, 16))
    loss = jax.block_until_ready(jax.jit(balanced_ce_loss_pallas)(pred, target))
    ref = jax.block_until_ready(balanced_ce_loss_ref(pred, target))
    assert jnp.allclose(loss, ref, atol=1e-5, rtol=1e-5), (loss, ref)

    # Odd-sized case exercising the masked tail tile, multiple tiles, and the
    # 2-chunk parallel split with a clamped index map.
    pred2, target2 = make_inputs(jax.random.PRNGKey(1), (3, 5, 29, 31))
    f2 = jax.jit(functools.partial(balanced_ce_loss_pallas, tile_rows=16, num_chunks=2))
    loss2 = jax.block_until_ready(f2(pred2, target2))
    ref2 = jax.block_until_ready(balanced_ce_loss_ref(pred2, target2))
    assert jnp.allclose(loss2, ref2, atol=1e-5, rtol=1e-5), (loss2, ref2)

    # bf16 inputs streamed at native width; math stays f32 in-kernel.
    pred3, target3 = make_inputs(jax.random.PRNGKey(2), (2, 4, 16, 16), dtype=jnp.bfloat16)
    loss3 = jax.block_until_ready(jax.jit(balanced_ce_loss_pallas)(pred3, target3))
    ref3 = jax.block_until_ready(balanced_ce_loss_ref(pred3, target3))
    assert jnp.allclose(loss3, ref3, atol=1e-5, rtol=1e-4), (loss3, ref3)

    print("KERNEL_OK")
</pallas_src>

<mosaic_0001>
module attributes {stable_mosaic.version = 11 : i64} {
  func.func @_balanced_ce_kernel(%arg0: i32, %arg1: i32, %arg2: memref<16x128xf32, #tpu.memory_space<vmem>>, %arg3: memref<16x128xf32, #tpu.memory_space<vmem>>, %arg4: memref<8x128xf32, #tpu.memory_space<vmem>>) attributes {dimension_semantics = [#tpu.dimension_semantics<parallel>, #tpu.dimension_semantics<arbitrary>], iteration_bounds = array<i64: 1, 1>, scalar_prefetch = 0 : i64, scratch_operands = 0 : i64, tpu.core_type = #tpu.core_type<tc>, window_params = [{transform_indices = @transform_0, window_bounds = array<i64: 16, 128>}, {transform_indices = @transform_1, window_bounds = array<i64: 16, 128>}, {transform_indices = @transform_2, window_bounds = array<i64: 8, 128>}]} {
    %c0_i32 = arith.constant 0 : i32
    %0 = arith.cmpi eq, %arg1, %c0_i32 : i32
    %1 = arith.extui %0 : i1 to i32
    %c0_i32_0 = arith.constant 0 : i32
    %2 = arith.cmpi ne, %1, %c0_i32_0 : i32
    scf.if %2 {
      %cst_13 = arith.constant 0.000000e+00 : f32
      %33 = vector.broadcast %cst_13 : f32 to vector<8x128xf32>
      %c0_14 = arith.constant 0 : index
      %c0_15 = arith.constant 0 : index
      %34 = vector.load %arg4[%c0_14, %c0_15] : memref<8x128xf32, #tpu.memory_space<vmem>>, vector<8x128xf32>
      tpu.vector_store %arg4[%c0_14, %c0_15], %33 {strides = array<i32>} : memref<8x128xf32, #tpu.memory_space<vmem>>, vector<8x128xf32>,
    } else {
    }
    %c0 = arith.constant 0 : index
    %c0_1 = arith.constant 0 : index
    %3 = vector.load %arg2[%c0, %c0_1] : memref<16x128xf32, #tpu.memory_space<vmem>>, vector<16x128xf32>
    %c0_2 = arith.constant 0 : index
    %c0_3 = arith.constant 0 : index
    %4 = vector.load %arg3[%c0_2, %c0_3] : memref<16x128xf32, #tpu.memory_space<vmem>>, vector<16x128xf32>
    %5 = math.log %3 : vector<16x128xf32>
    %cst = arith.constant -1.000000e+02 : f32
    %6 = vector.broadcast %cst : f32 to vector<16x128xf32>
    %7 = arith.maximumf %5, %6 : vector<16x128xf32>
    %cst_4 = arith.constant 1.000000e+00 : f32
    %8 = vector.broadcast %cst_4 : f32 to vector<16x128xf32>
    %9 = arith.subf %8, %3 : vector<16x128xf32>
    %10 = math.log %9 : vector<16x128xf32>
    %cst_5 = arith.constant -1.000000e+02 : f32
    %11 = vector.broadcast %cst_5 : f32 to vector<16x128xf32>
    %12 = arith.maximumf %10, %11 : vector<16x128xf32>
    %13 = arith.mulf %4, %7 : vector<16x128xf32>
    %cst_6 = arith.constant 1.000000e+00 : f32
    %14 = vector.broadcast %cst_6 : f32 to vector<16x128xf32>
    %15 = arith.subf %14, %4 : vector<16x128xf32>
    %16 = arith.mulf %15, %12 : vector<16x128xf32>
    %17 = arith.addf %13, %16 : vector<16x128xf32>
    %cst_7 = arith.constant 0.000000e+00 : f32
    %18 = vector.broadcast %cst_7 : f32 to vector<16x128xf32>
    %19 = arith.subf %18, %17 : vector<16x128xf32>
    %cst_8 = arith.constant 0.000000e+00 : f32
    %20 = vector.broadcast %cst_8 : f32 to vector<16x128xf32>
    %21 = arith.cmpf ogt, %4, %20 : vector<16x128xf32>
    %22 = arith.mulf %4, %19 : vector<16x128xf32>
    %c1_i32 = arith.constant 1 : i32
    %23 = arith.muli %arg0, %c1_i32 : i32
    %24 = arith.addi %23, %arg1 : i32
    %c2048_i32 = arith.constant 2048 : i32
    %25 = arith.muli %24, %c2048_i32 : i32
    %c2048_i32_9 = arith.constant 2048 : i32
    %26 = arith.addi %25, %c2048_i32_9 : i32
    %c2048_i32_10 = arith.constant 2048 : i32
    %27 = arith.cmpi sle, %26, %c2048_i32_10 : i32
    %28 = arith.extui %27 : i1 to i32
    %c0_i32_11 = arith.constant 0 : i32
    %29 = arith.cmpi ne, %28, %c0_i32_11 : i32
    scf.if %29 {
      %cst_13 = arith.constant dense<true> : vector<16x128xi1>
      %33 = arith.xori %21, %cst_13 : vector<16x128xi1>
      %cst_14 = arith.constant 0.000000e+00 : f32
      %34 = vector.broadcast %cst_14 : f32 to vector<16x128xf32>
      %35 = arith.select %21, %22, %34 : vector<16x128xi1>, vector<16x128xf32>
      %cst_15 = arith.constant dense<0.000000e+00> : vector<128xf32>
      %36 = vector.multi_reduction <add>, %35, %cst_15 [0] : vector<16x128xf32> to vector<128xf32>
      %37 = vector.shape_cast %36 : vector<128xf32> to vector<1x128xf32>
      %cst_16 = arith.constant 0.000000e+00 : f32
      %38 = vector.broadcast %cst_16 : f32 to vector<16x128xf32>
      %39 = arith.select %33, %19, %38 : vector<16x128xi1>, vector<16x128xf32>
      %cst_17 = arith.constant dense<0.000000e+00> : vector<128xf32>
      %40 = vector.multi_reduction <add>, %39, %cst_17 [0] : vector<16x128xf32> to vector<128xf32>
      %41 = vector.shape_cast %40 : vector<128xf32> to vector<1x128xf32>
      %cst_18 = arith.constant 1.000000e+00 : f32
      %cst_19 = arith.constant 0.000000e+00 : f32
      %42 = vector.broadcast %cst_18 : f32 to vector<16x128xf32>
      %43 = vector.broadcast %cst_19 : f32 to vector<16x128xf32>
      %44 = arith.select %21, %42, %43 : vector<16x128xi1>, vector<16x128xf32>
      %cst_20 = arith.constant dense<0.000000e+00> : vector<128xf32>
      %45 = vector.multi_reduction <add>, %44, %cst_20 [0] : vector<16x128xf32> to vector<128xf32>
      %46 = vector.shape_cast %45 : vector<128xf32> to vector<1x128xf32>
      %c0_21 = arith.constant 0 : index
      %c0_22 = arith.constant 0 : index
      %47 = vector.load %arg4[%c0_21, %c0_22] : memref<8x128xf32, #tpu.memory_space<vmem>>, vector<1x128xf32>
      %48 = arith.addf %47, %37 : vector<1x128xf32>
      %c0_23 = arith.constant 0 : index
      %c0_24 = arith.constant 0 : index
      %49 = vector.load %arg4[%c0_23, %c0_24] : memref<8x128xf32, #tpu.memory_space<vmem>>, vector<1x128xf32>
      tpu.vector_store %arg4[%c0_23, %c0_24], %48 {strides = array<i32>} : memref<8x128xf32, #tpu.memory_space<vmem>>, vector<1x128xf32>,
      %c1 = arith.constant 1 : index
      %c0_25 = arith.constant 0 : index
      %50 = vector.load %arg4[%c1, %c0_25] : memref<8x128xf32, #tpu.memory_space<vmem>>, vector<1x128xf32>
      %51 = arith.addf %50, %41 : vector<1x128xf32>
      %c1_26 = arith.constant 1 : index
      %c0_27 = arith.constant 0 : index
      %52 = vector.load %arg4[%c1_26, %c0_27] : memref<8x128xf32, #tpu.memory_space<vmem>>, vector<1x128xf32>
      tpu.vector_store %arg4[%c1_26, %c0_27], %51 {strides = array<i32>} : memref<8x128xf32, #tpu.memory_space<vmem>>, vector<1x128xf32>,
      %c2 = arith.constant 2 : index
      %c0_28 = arith.constant 0 : index
      %53 = vector.load %arg4[%c2, %c0_28] : memref<8x128xf32, #tpu.memory_space<vmem>>, vector<1x128xf32>
      %54 = arith.addf %53, %46 : vector<1x128xf32>
      %c2_29 = arith.constant 2 : index
      %c0_30 = arith.constant 0 : index
      %55 = vector.load %arg4[%c2_29, %c0_30] : memref<8x128xf32, #tpu.memory_space<vmem>>, vector<1x128xf32>
      tpu.vector_store %arg4[%c2_29, %c0_30], %54 {strides = array<i32>} : memref<8x128xf32, #tpu.memory_space<vmem>>, vector<1x128xf32>,
    } else {
    }
    %true = arith.constant true
    %30 = arith.xori %27, %true : i1
    %31 = arith.extui %30 : i1 to i32
    %c0_i32_12 = arith.constant 0 : i32
    %32 = arith.cmpi ne, %31, %c0_i32_12 : i32
    scf.if %32 {
      %33 = tpu.iota {dimensions = array<i32: 0>} : vector<16x128xi32>
      %34 = tpu.iota {dimensions = array<i32: 1>} : vector<16x128xi32>
      %c128_i32 = arith.constant 128 : i32
      %35 = vector.broadcast %c128_i32 : i32 to vector<16x128xi32>
      %36 = arith.muli %33, %35 : vector<16x128xi32>
      %37 = vector.broadcast %25 : i32 to vector<16x128xi32>
      %38 = arith.addi %37, %36 : vector<16x128xi32>
      %39 = arith.addi %38, %34 : vector<16x128xi32>
      %c2048_i32_13 = arith.constant 2048 : i32
      %40 = vector.broadcast %c2048_i32_13 : i32 to vector<16x128xi32>
      %41 = arith.cmpi slt, %39, %40 : vector<16x128xi32>
      %42 = arith.andi %41, %21 : vector<16x128xi1>
      %cst_14 = arith.constant dense<true> : vector<16x128xi1>
      %43 = arith.xori %21, %cst_14 : vector<16x128xi1>
      %44 = arith.andi %41, %43 : vector<16x128xi1>
      %cst_15 = arith.constant 0.000000e+00 : f32
      %45 = vector.broadcast %cst_15 : f32 to vector<16x128xf32>
      %46 = arith.select %42, %22, %45 : vector<16x128xi1>, vector<16x128xf32>
      %cst_16 = arith.constant dense<0.000000e+00> : vector<128xf32>
      %47 = vector.multi_reduction <add>, %46, %cst_16 [0] : vector<16x128xf32> to vector<128xf32>
      %48 = vector.shape_cast %47 : vector<128xf32> to vector<1x128xf32>
      %cst_17 = arith.constant 0.000000e+00 : f32
      %49 = vector.broadcast %cst_17 : f32 to vector<16x128xf32>
      %50 = arith.select %44, %19, %49 : vector<16x128xi1>, vector<16x128xf32>
      %cst_18 = arith.constant dense<0.000000e+00> : vector<128xf32>
      %51 = vector.multi_reduction <add>, %50, %cst_18 [0] : vector<16x128xf32> to vector<128xf32>
      %52 = vector.shape_cast %51 : vector<128xf32> to vector<1x128xf32>
      %cst_19 = arith.constant 1.000000e+00 : f32
      %cst_20 = arith.constant 0.000000e+00 : f32
      %53 = vector.broadcast %cst_19 : f32 to vector<16x128xf32>
      %54 = vector.broadcast %cst_20 : f32 to vector<16x128xf32>
      %55 = arith.select %42, %53, %54 : vector<16x128xi1>, vector<16x128xf32>
      %cst_21 = arith.constant dense<0.000000e+00> : vector<128xf32>
      %56 = vector.multi_reduction <add>, %55, %cst_21 [0] : vector<16x128xf32> to vector<128xf32>
      %57 = vector.shape_cast %56 : vector<128xf32> to vector<1x128xf32>
      %c0_22 = arith.constant 0 : index
      %c0_23 = arith.constant 0 : index
      %58 = vector.load %arg4[%c0_22, %c0_23] : memref<8x128xf32, #tpu.memory_space<vmem>>, vector<1x128xf32>
      %59 = arith.addf %58, %48 : vector<1x128xf32>
      %c0_24 = arith.constant 0 : index
      %c0_25 = arith.constant 0 : index
      %60 = vector.load %arg4[%c0_24, %c0_25] : memref<8x128xf32, #tpu.memory_space<vmem>>, vector<1x128xf32>
      tpu.vector_store %arg4[%c0_24, %c0_25], %59 {strides = array<i32>} : memref<8x128xf32, #tpu.memory_space<vmem>>, vector<1x128xf32>,
      %c1 = arith.constant 1 : index
      %c0_26 = arith.constant 0 : index
      %61 = vector.load %arg4[%c1, %c0_26] : memref<8x128xf32, #tpu.memory_space<vmem>>, vector<1x128xf32>
      %62 = arith.addf %61, %52 : vector<1x128xf32>
      %c1_27 = arith.constant 1 : index
      %c0_28 = arith.constant 0 : index
      %63 = vector.load %arg4[%c1_27, %c0_28] : memref<8x128xf32, #tpu.memory_space<vmem>>, vector<1x128xf32>
      tpu.vector_store %arg4[%c1_27, %c0_28], %62 {strides = array<i32>} : memref<8x128xf32, #tpu.memory_space<vmem>>, vector<1x128xf32>,
      %c2 = arith.constant 2 : index
      %c0_29 = arith.constant 0 : index
      %64 = vector.load %arg4[%c2, %c0_29] : memref<8x128xf32, #tpu.memory_space<vmem>>, vector<1x128xf32>
      %65 = arith.addf %64, %57 : vector<1x128xf32>
      %c2_30 = arith.constant 2 : index
      %c0_31 = arith.constant 0 : index
      %66 = vector.load %arg4[%c2_30, %c0_31] : memref<8x128xf32, #tpu.memory_space<vmem>>, vector<1x128xf32>
      tpu.vector_store %arg4[%c2_30, %c0_31], %65 {strides = array<i32>} : memref<8x128xf32, #tpu.memory_space<vmem>>, vector<1x128xf32>,
    } else {
    }
    return
  }
  func.func @transform_0(%arg0: i32, %arg1: i32) -> (i32, i32) {
    %c1_i32 = arith.constant 1 : i32
    %0 = arith.muli %arg0, %c1_i32 : i32
    %1 = arith.addi %0, %arg1 : i32
    %c0_i32 = arith.constant 0 : i32
    %c0_i32_0 = arith.constant 0 : i32
    return %1, %c0_i32 : i32, i32
  }
  func.func @transform_1(%arg0: i32, %arg1: i32) -> (i32, i32) {
    %c1_i32 = arith.constant 1 : i32
    %0 = arith.muli %arg0, %c1_i32 : i32
    %1 = arith.addi %0, %arg1 : i32
    %c0_i32 = arith.constant 0 : i32
    %c0_i32_0 = arith.constant 0 : i32
    return %1, %c0_i32 : i32, i32
  }
  func.func @transform_2(%arg0: i32, %arg1: i32) -> (i32, i32) {
    %c0_i32 = arith.constant 0 : i32
    %c0_i32_0 = arith.constant 0 : i32
    return %arg0, %c0_i32 : i32, i32
  }
}

</mosaic_0001>

<bundles_post_ra>
// kernel: balanced_ce_loss_pallas.1
= control target key start
LH: loop header
LB: loop body
LE: loop exit
PB: predicated region body
PF: predicated region fallthrough
CT: control target
= control target key end

     0   :  { %v223_v0 = vmov 0.0   ;;  %vm224_vm2 = vmmov 1   ;;  %s279_s0 = inlined_call_operand.vmem [shape: f32[16,128], index: 0, kind: input, shape index: {}]   ;;  %s280_s1 = inlined_call_operand.vmem [shape: f32[16,128], index: 1, kind: input, shape index: {}]   ;;  %s281_s2 = inlined_call_operand.vmem [shape: f32[8,128], index: 2, kind: output, shape index: {}]  }
   0x1   :  { %59 = vst [vmem:[%s281_s2] sm:$0xff] %v223_v0  ;;  %v60_v1 = vld [vmem:[%s279_s0] sm:$0xff]  ;;  %v61_v2 = vld [vmem:[%s279_s0 + $0x8] sm:$0xff] }
   0x2   :  { %v62_v3 = vld [vmem:[%s280_s1] sm:$0xff]  ;;  %v63_v4 = vld [vmem:[%s280_s1 + $0x8] sm:$0xff]  ;;  %215 = vlog2.f32 %v60_v1  ;;  %v70_v5 = vsub.f32 1.0, %v60_v1  ;;  %v71_v6 = vsub.f32 1.0, %v61_v2 }
   0x3   :  { %217 = vlog2.f32 %v61_v2  ;;  %vm88_vm0 = vcmp.gt.f32.partialorder %v62_v3, 0.0  ;;  %vm89_vm1 = vcmp.gt.f32.partialorder %v63_v4, 0.0  ;;  %v80_v20 = vsub.f32 1.0, %v62_v3 }
   0x4   :  { %219 = vlog2.f32 %v70_v5  ;;  %v119_v7 = vsel %vm88_vm0, 1.0, %v223_v0  ;;  %v120_v8 = vsel %vm89_vm1, 1.0, %v223_v0  ;;  %v81_v24 = vsub.f32 1.0, %v63_v4  ;;  %vm99_vm3 = vmxor %vm88_vm0, %vm224_vm2 }
   0x5   :  { %221 = vlog2.f32 %v71_v6  ;;  %v121_v9 = vadd.f32 %v120_v8, %v119_v7  ;;  %vm100_vm4 = vmxor %vm89_vm1, %vm224_vm2 }
   0x7   :  { %v122_v10 = vrot.slane %v121_v9, 4 }
   0x8   :  { %v216_v11 = vpop.eup %215  ;;  %v134_v33 = vld [vmem:[%s281_s2 + $0x2] sm:$0x1]  ;;  %v131_v57 = vld [vmem:[%s281_s2 + $0x1] sm:$0x1]  ;;  %v128_v60 = vld [vmem:[%s281_s2] sm:$0x1] }
   0x9   :  { %v218_v12 = vpop.eup %217  ;;  %v65_v13 = vmul.f32 0.6931472, %v216_v11  ;;  %v123_v14 = vadd.f32 %v122_v10, %v121_v9 }
   0xa   :  { %v220_v15 = vpop.eup %219  ;;  %v67_v16 = vmul.f32 0.6931472, %v218_v12 }
   0xb   :  { %v222_v17 = vpop.eup %221  ;;  %v68_v18 = vmax.f32 %v65_v13, -100.0  ;;  %v73_v19 = vmul.f32 0.6931472, %v220_v15  ;;  %v124_v21 = vrot.slane %v123_v14, 2 }
   0xc   :  { %v69_v22 = vmax.f32 %v67_v16, -100.0  ;;  %v75_v23 = vmul.f32 0.6931472, %v222_v17 }
   0xd   :  { %v76_v25 = vmax.f32 %v73_v19, -100.0  ;;  %v78_v26 = vmul.f32 %v68_v18, %v62_v3  ;;  %v125_v27 = vadd.f32 %v124_v21, %v123_v14 }
   0xe   :  { %v77_v28 = vmax.f32 %v75_v23, -100.0  ;;  %v79_v29 = vmul.f32 %v69_v22, %v63_v4 }
   0xf   :  { %v82_v30 = vmul.f32 %v80_v20, %v76_v25  ;;  %v126_v31 = vrot.slane %v125_v27, 1 }
  0x10   :  { %v83_v32 = vmul.f32 %v81_v24, %v77_v28 }
  0x11   :  { %v84_v34 = vadd.f32 %v82_v30, %v78_v26  ;;  %v127_v35 = vadd.f32 %v126_v31, %v125_v27 }
  0x12   :  { %v85_v36 = vadd.f32 %v83_v32, %v79_v29 }
  0x13   :  { %v86_v37 = vsub.f32 0.0, %v84_v34  ;;  %v135_v38 = vadd.f32 %v134_v33, %v127_v35 }
  0x14   :  { %v87_v39 = vsub.f32 0.0, %v85_v36 }
  0x15   :  { %v90_v40 = vmul.f32 %v86_v37, %v62_v3  ;;  %v110_v41 = vsel %vm99_vm3, %v86_v37, 0.0  ;;  %136 = vst [vmem:[%s281_s2 + $0x2] sm:$0x1] %v135_v38 }
  0x16   :  { %v91_v42 = vmul.f32 %v87_v39, %v63_v4  ;;  %v111_v43 = vsel %vm100_vm4, %v87_v39, 0.0 }
  0x17   :  { %v101_v44 = vsel %vm88_vm0, %v90_v40, 0.0  ;;  %v112_v45 = vadd.f32 %v111_v43, %v110_v41 }
  0x18   :  { %v102_v46 = vsel %vm89_vm1, %v91_v42, 0.0 }
  0x19   :  { %v103_v47 = vadd.f32 %v102_v46, %v101_v44  ;;  %v113_v48 = vrot.slane %v112_v45, 4 }
  0x1b   :  { %v104_v49 = vrot.slane %v103_v47, 4  ;;  %v114_v50 = vadd.f32 %v113_v48, %v112_v45 }
  0x1d   :  { %v105_v51 = vadd.f32 %v104_v49, %v103_v47  ;;  %v115_v52 = vrot.slane %v114_v50, 2 }
  0x1f   :  { %v106_v53 = vrot.slane %v105_v51, 2  ;;  %v116_v54 = vadd.f32 %v115_v52, %v114_v50 }
  0x21   :  { %v107_v55 = vadd.f32 %v106_v53, %v105_v51  ;;  %v117_v56 = vrot.slane %v116_v54, 1 }
  0x23   :  { %v108_v58 = vrot.slane %v107_v55, 1  ;;  %v118_v59 = vadd.f32 %v117_v56, %v116_v54 }
  0x25   :  { %v109_v61 = vadd.f32 %v108_v58, %v107_v55  ;;  %v132_v62 = vadd.f32 %v131_v57, %v118_v59 }
  0x27   :  { %v129_v63 = vadd.f32 %v128_v60, %v109_v61  ;;  %133 = vst [vmem:[%s281_s2 + $0x1] sm:$0x1] %v132_v62 }
  0x29   :  { %130 = vst [vmem:[%s281_s2] sm:$0x1] %v129_v63 }

</bundles_post_ra>
